<compile_context>
chip_gen: v7x
topology: tpu7x:2x2x1
jax: 0.10.0
libtpu: 0.0.40
codegen_flags: <defaults>
</compile_context>

<pallas_src>
import functools

import jax
import jax.numpy as jnp
import numpy as np
from jax import lax
from jax.experimental import pallas as pl
from jax.experimental.pallas import tpu as pltpu

# Stay under the 64 MiB/TC VMEM of v7x while still unlocking >default tiles on v5e/v6e.
_VMEM_LIMIT_BYTES = 48 * 1024 * 1024


def _pick_tile(dim, candidates):
    """Largest candidate tile that evenly divides `dim`; else the full dim (un-tiled)."""
    for c in candidates:
        if dim >= c and dim % c == 0:
            return c
    return dim


_GELU_C = float(np.sqrt(2.0 / np.pi))


def _gelu_new(x):
    # HF GPT-2 "gelu_new"
    return 0.5 * x * (1.0 + jnp.tanh(_GELU_C * (x + 0.044715 * (x * x * x))))


# ----------------------------------------------------------------------------
# Kernel 1: Conv1D (x @ W + b), full-K, tiled over (M, N).
# Optional fused LayerNorm prologue, gelu_new and/or residual add epilogue.
# bf16 MXU operands, f32 accumulation.
# ----------------------------------------------------------------------------
def _linear_kernel(x_ref, w_ref, b_ref, *rest, activation, has_residual, has_ln, eps):
    idx = 0
    if has_ln:
        g_ref, beta_ref = rest[0], rest[1]
        idx = 2
    if has_residual:
        r_ref = rest[idx]
        idx += 1
    o_ref = rest[idx]

    x = x_ref[...].astype(jnp.float32)                         # (tm, K)
    if has_ln:
        mu = jnp.mean(x, axis=-1, keepdims=True)
        xc = x - mu
        var = jnp.mean(xc * xc, axis=-1, keepdims=True)
        x = (xc * lax.rsqrt(var + eps) * g_ref[...].astype(jnp.float32)
             + beta_ref[...].astype(jnp.float32))

    y = jnp.dot(x.astype(jnp.bfloat16), w_ref[...].astype(jnp.bfloat16),
                preferred_element_type=jnp.float32)            # (tm, tn) f32
    y = y + b_ref[...].astype(jnp.float32)
    if activation == "gelu_new":
        y = _gelu_new(y)
    if has_residual:
        y = y + r_ref[...].astype(jnp.float32)
    o_ref[...] = y.astype(o_ref.dtype)


def linear(x2d, w, b, *, activation=None, residual=None,
           ln_gamma=None, ln_beta=None, ln_eps=1e-5):
    """Conv1D: [LN(x2d)] @ w + b with optional fused activation / residual.

    Full-K contraction in a single block (GPT-2 K of 768/3072 comfortably fits VMEM),
    so the grid is purely (M/tm, N/tn) parallel tiles."""
    M, K = x2d.shape
    N = w.shape[1]
    tm = _pick_tile(M, (512, 256, 128, 64, 32, 16, 8))
    tn = _pick_tile(N, (512, 256, 128))
    has_ln = ln_gamma is not None

    in_specs = [
        pl.BlockSpec((tm, K), lambda i, j: (i, 0)),     # x block resident across j
        pl.BlockSpec((K, tn), lambda i, j: (0, j)),
        pl.BlockSpec((1, tn), lambda i, j: (0, j)),
    ]
    args = [x2d, w, b.reshape(1, N)]
    if has_ln:
        in_specs.append(pl.BlockSpec((1, K), lambda i, j: (0, 0)))
        in_specs.append(pl.BlockSpec((1, K), lambda i, j: (0, 0)))
        args += [ln_gamma.reshape(1, K), ln_beta.reshape(1, K)]
    if residual is not None:
        in_specs.append(pl.BlockSpec((tm, tn), lambda i, j: (i, j)))
        args.append(residual)

    kernel = functools.partial(_linear_kernel, activation=activation,
                               has_residual=residual is not None,
                               has_ln=has_ln, eps=ln_eps)
    return pl.pallas_call(
        kernel,
        out_shape=jax.ShapeDtypeStruct((M, N), x2d.dtype),
        grid=(M // tm, N // tn),
        in_specs=in_specs,
        out_specs=pl.BlockSpec((tm, tn), lambda i, j: (i, j)),
        compiler_params=pltpu.CompilerParams(
            dimension_semantics=("parallel", "parallel"),
            vmem_limit_bytes=_VMEM_LIMIT_BYTES),
    )(*args)


# ----------------------------------------------------------------------------
# Kernel 2: causal flash attention (online softmax), heads handled in-kernel.
# ----------------------------------------------------------------------------
def _flash_attn_kernel(q_ref, k_ref, v_ref, o_ref, m_sc, l_sc, acc_sc, qs_sc,
                       *, num_heads, head_dim, scale, masked_bias):
    tq = q_ref.shape[1]
    tk = k_ref.shape[1]
    qi = pl.program_id(1)
    ki = pl.program_id(2)
    q_start = qi * tq
    k_start = ki * tk

    @pl.when(ki == 0)
    def _():
        m_sc[...] = jnp.full_like(m_sc, -jnp.inf)
        l_sc[...] = jnp.zeros_like(l_sc)
        acc_sc[...] = jnp.zeros_like(acc_sc)
        # Fold the softmax scale into q once per Q tile; keep bf16 MXU operands.
        qs_sc[...] = (q_ref[...].astype(jnp.float32) * scale).astype(jnp.bfloat16)

    # Skip compute for K tiles entirely in the causal future of this Q tile
    # (their DMA is also skipped via the clamped K/V index_map in the wrapper).
    @pl.when(k_start <= q_start + (tq - 1))
    def _():
        row = q_start + lax.broadcasted_iota(jnp.int32, (tq, tk), 0)
        col = k_start + lax.broadcasted_iota(jnp.int32, (tq, tk), 1)
        causal = col <= row
        bias = jnp.float32(masked_bias)
        for h in range(num_heads):          # static unroll; head slices are static
            lo = h * head_dim
            hi = lo + head_dim
            q = qs_sc[0, :, lo:hi]                              # (tq, D) bf16, pre-scaled
            k = k_ref[0, :, lo:hi].astype(jnp.bfloat16)         # (tk, D)
            v = v_ref[0, :, lo:hi].astype(jnp.bfloat16)         # (tk, D)
            # q @ k^T without materializing a transposed copy of K.
            s = lax.dot_general(q, k, (((1,), (1,)), ((), ())),
                                preferred_element_type=jnp.float32)
            s = jnp.where(causal, s, bias)

            m_prev = m_sc[h]                                            # (tq, 1)
            m_new = jnp.maximum(m_prev, jnp.max(s, axis=-1, keepdims=True))
            alpha = jnp.exp(m_prev - m_new)
            p = jnp.exp(s - m_new)                                      # (tq, tk)
            l_sc[h] = alpha * l_sc[h] + jnp.sum(p, axis=-1, keepdims=True)
            # Aligned per-head accumulator slab (no mid-lane RMW per k step).
            acc_sc[h] = alpha * acc_sc[h] + jnp.dot(
                p.astype(jnp.bfloat16), v, preferred_element_type=jnp.float32)
            m_sc[h] = m_new

    @pl.when(ki == pl.num_programs(2) - 1)
    def _():
        # Normalize and write the merged-heads output lane-dense into (1, tq, E),
        # once per Q tile.
        for h in range(num_heads):
            lo = h * head_dim
            hi = lo + head_dim
            inv = pl.reciprocal(l_sc[h], approx=True)
            o_ref[0, :, lo:hi] = (acc_sc[h] * inv).astype(o_ref.dtype)


def flash_causal_attention(qkv, *, num_heads, scale, masked_bias=-10000.0):
    """qkv: (B, T, 3E) lane-dense c_attn output.  Returns merged-heads output (B, T, E)."""
    B, T, E3 = qkv.shape
    E = E3 // 3
    D = E // num_heads
    tq = _pick_tile(T, (256, 128, 64, 32, 16, 8))
    tk = _pick_tile(T, (128, 64, 32, 16, 8))

    packed = (E % 128 == 0)
    if packed:
        # Slice Q/K/V straight out of the packed qkv via the index_map last-axis block;
        # no jnp.split round trip through HBM.
        q_in = k_in = v_in = qkv
        q_blk, k_blk, v_blk = 0, 1, 2
    else:
        # Small / unaligned embed dims: fall back to explicit split so every BlockSpec
        # uses full-dim last-axis blocks (keeps the (8,128) layout rule satisfied).
        q_in, k_in, v_in = jnp.split(qkv, 3, axis=-1)
        q_blk = k_blk = v_blk = 0

    def q_map(b, i, j):
        return (b, i, q_blk)

    def kv_map(blk):
        def index_map(b, i, j):
            # Clamp to the causal range: fully-masked future K/V tiles map to the last
            # useful block index, so their DMA is skipped by the pipeline.
            jmax = (i * tq + (tq - 1)) // tk
            return (b, jnp.minimum(j, jmax), blk)
        return index_map

    kernel = functools.partial(_flash_attn_kernel, num_heads=num_heads,
                               head_dim=D, scale=scale, masked_bias=masked_bias)
    return pl.pallas_call(
        kernel,
        out_shape=jax.ShapeDtypeStruct((B, T, E), qkv.dtype),
        grid=(B, T // tq, T // tk),
        in_specs=[
            pl.BlockSpec((1, tq, E), q_map),
            pl.BlockSpec((1, tk, E), kv_map(k_blk)),
            pl.BlockSpec((1, tk, E), kv_map(v_blk)),
        ],
        out_specs=pl.BlockSpec((1, tq, E), lambda b, i, j: (b, i, 0)),
        scratch_shapes=[
            pltpu.VMEM((num_heads, tq, 1), jnp.float32),   # running max m (per head)
            pltpu.VMEM((num_heads, tq, 1), jnp.float32),   # running sum l (per head)
            pltpu.VMEM((num_heads, tq, D), jnp.float32),   # aligned per-head accumulator
            pltpu.VMEM((1, tq, E), jnp.bfloat16),          # pre-scaled bf16 q
        ],
        compiler_params=pltpu.CompilerParams(
            dimension_semantics=("parallel", "parallel", "arbitrary"),
            vmem_limit_bytes=_VMEM_LIMIT_BYTES),
    )(q_in, k_in, v_in)


# ----------------------------------------------------------------------------
# GPT2Block forward (default path: self-attn, no cache / prompts / masks).
# ----------------------------------------------------------------------------
def gpt2_block_forward(hidden_states, params, num_heads, *,
                       scale_attn_weights=True, layer_norm_eps=1e-5):
    B, T, E = hidden_states.shape
    D = E // num_heads
    x2d = hidden_states.reshape(B * T, E)

    # ---- attention sub-block -----------------------------------------------
    # ln_1 is fused into the c_attn prologue (no standalone LN HBM round trip).
    qkv = linear(x2d, params["c_attn_w"], params["c_attn_b"],
                 ln_gamma=params["ln_1_g"], ln_beta=params["ln_1_b"],
                 ln_eps=layer_norm_eps)                                # (B*T, 3E)
    scale = 1.0 / float(D) ** 0.5 if scale_attn_weights else 1.0
    attn = flash_causal_attention(qkv.reshape(B, T, 3 * E),
                                  num_heads=num_heads, scale=scale)    # (B, T, E)
    # c_proj with the residual (pre-LN hidden_states) fused into the epilogue.
    h_attn = linear(attn.reshape(B * T, E), params["c_proj_w"], params["c_proj_b"],
                    residual=x2d)

    # ---- MLP sub-block -------------------------------------------------------
    # ln_2 fused into the fc prologue; gelu_new fused into its epilogue.
    h_fc = linear(h_attn, params["mlp_fc_w"], params["mlp_fc_b"],
                  activation="gelu_new",
                  ln_gamma=params["ln_2_g"], ln_beta=params["ln_2_b"],
                  ln_eps=layer_norm_eps)
    out = linear(h_fc, params["mlp_proj_w"], params["mlp_proj_b"], residual=h_attn)
    return out.reshape(B, T, E)


# ----------------------------------------------------------------------------
# Pure-JAX f32 reference (mirrors the PyTorch GPT2Block semantics).
# ----------------------------------------------------------------------------
def gpt2_block_reference(hidden_states, params, num_heads, *, eps=1e-5):
    B, T, E = hidden_states.shape
    D = E // num_heads

    def ln(x, g, b):
        mu = jnp.mean(x, axis=-1, keepdims=True)
        var = jnp.mean((x - mu) ** 2, axis=-1, keepdims=True)
        return (x - mu) / jnp.sqrt(var + eps) * g + b

    residual = hidden_states
    h = ln(hidden_states, params["ln_1_g"], params["ln_1_b"])
    qkv = h.reshape(B * T, E) @ params["c_attn_w"] + params["c_attn_b"]
    q, k, v = jnp.split(qkv.reshape(B, T, 3 * E), 3, axis=-1)
    sh = lambda t: t.reshape(B, T, num_heads, D).transpose(0, 2, 1, 3)
    q, k, v = sh(q), sh(k), sh(v)
    s = jnp.einsum("bhqd,bhkd->bhqk", q, k) / float(D) ** 0.5
    mask = jnp.tril(jnp.ones((T, T), dtype=bool))
    s = jnp.where(mask, s, jnp.float32(-10000.0))
    p = jax.nn.softmax(s, axis=-1)
    o = jnp.einsum("bhqk,bhkd->bhqd", p, v)
    o = o.transpose(0, 2, 1, 3).reshape(B * T, E)
    o = o @ params["c_proj_w"] + params["c_proj_b"]
    hidden = o.reshape(B, T, E) + residual

    residual2 = hidden
    h2 = ln(hidden, params["ln_2_g"], params["ln_2_b"])
    ff = _gelu_new(h2.reshape(B * T, E) @ params["mlp_fc_w"] + params["mlp_fc_b"])
    ff = ff @ params["mlp_proj_w"] + params["mlp_proj_b"]
    return residual2 + ff.reshape(B, T, E)


if __name__ == "__main__":
    # Small config: hidden_size=32, num_attention_heads=4, seq=8, batch=2, inner=4*32
    B, T, E, H = 2, 8, 32, 4
    inner = 4 * E

    key = jax.random.PRNGKey(0)
    ks = jax.random.split(key, 13)

    hidden_states = jax.random.normal(ks[0], (B, T, E), dtype=jnp.float32)

    params = {
        "ln_1_g": 1.0 + 0.1 * jax.random.normal(ks[1], (E,), dtype=jnp.float32),
        "ln_1_b": 0.1 * jax.random.normal(ks[2], (E,), dtype=jnp.float32),
        "c_attn_w": 0.02 * jax.random.normal(ks[3], (E, 3 * E), dtype=jnp.float32),
        "c_attn_b": 0.01 * jax.random.normal(ks[4], (3 * E,), dtype=jnp.float32),
        "c_proj_w": 0.02 * jax.random.normal(ks[5], (E, E), dtype=jnp.float32),
        "c_proj_b": 0.01 * jax.random.normal(ks[6], (E,), dtype=jnp.float32),
        "ln_2_g": 1.0 + 0.1 * jax.random.normal(ks[7], (E,), dtype=jnp.float32),
        "ln_2_b": 0.1 * jax.random.normal(ks[8], (E,), dtype=jnp.float32),
        "mlp_fc_w": 0.02 * jax.random.normal(ks[9], (E, inner), dtype=jnp.float32),
        "mlp_fc_b": 0.01 * jax.random.normal(ks[10], (inner,), dtype=jnp.float32),
        "mlp_proj_w": 0.02 * jax.random.normal(ks[11], (inner, E), dtype=jnp.float32),
        "mlp_proj_b": 0.01 * jax.random.normal(ks[12], (E,), dtype=jnp.float32),
    }

    out = gpt2_block_forward(hidden_states, params, num_heads=H)
    out = jax.block_until_ready(out)

    ref = gpt2_block_reference(hidden_states, params, num_heads=H)
    ref = jax.block_until_ready(ref)

    # bf16 MXU operands (f32 accumulate) => bf16-appropriate tolerances vs the f32 reference.
    np.testing.assert_allclose(np.asarray(out), np.asarray(ref), rtol=2e-2, atol=2e-2)
    print("KERNEL_OK")
</pallas_src>

<mosaic_0001>
module attributes {stable_mosaic.version = 11 : i64} {
  func.func @_linear_kernel(%arg0: i32, %arg1: i32, %arg2: memref<16x32xf32, #tpu.memory_space<vmem>>, %arg3: memref<32x96xf32, #tpu.memory_space<vmem>>, %arg4: memref<1x96xf32, #tpu.memory_space<vmem>>, %arg5: memref<1x32xf32, #tpu.memory_space<vmem>>, %arg6: memref<1x32xf32, #tpu.memory_space<vmem>>, %arg7: memref<16x96xf32, #tpu.memory_space<vmem>>) attributes {dimension_semantics = [#tpu.dimension_semantics<parallel>, #tpu.dimension_semantics<parallel>], iteration_bounds = array<i64: 1, 1>, scalar_prefetch = 0 : i64, scratch_operands = 0 : i64, tpu.core_type = #tpu.core_type<tc>, window_params = [{transform_indices = @transform_0, window_bounds = array<i64: 16, 32>}, {transform_indices = @transform_1, window_bounds = array<i64: 32, 96>}, {transform_indices = @transform_2, window_bounds = array<i64: 1, 96>}, {pipeline_mode = #tpu.pipeline_mode<synchronous>, transform_indices = @transform_3, window_bounds = array<i64: 1, 32>}, {pipeline_mode = #tpu.pipeline_mode<synchronous>, transform_indices = @transform_4, window_bounds = array<i64: 1, 32>}, {transform_indices = @transform_5, window_bounds = array<i64: 16, 96>}]} {
    %c0 = arith.constant 0 : index
    %c0_0 = arith.constant 0 : index
    %0 = vector.load %arg2[%c0, %c0_0] : memref<16x32xf32, #tpu.memory_space<vmem>>, vector<16x32xf32>
    %cst = arith.constant dense<0.000000e+00> : vector<16xf32>
    %1 = vector.multi_reduction <add>, %0, %cst [1] : vector<16x32xf32> to vector<16xf32>
    %2 = vector.shape_cast %1 : vector<16xf32> to vector<16x1xf32>
    %cst_1 = arith.constant 3.200000e+01 : f32
    %3 = vector.broadcast %cst_1 : f32 to vector<16x1xf32>
    %4 = arith.divf %2, %3 : vector<16x1xf32>
    %5 = vector.broadcast %4 : vector<16x1xf32> to vector<16x32xf32>
    %6 = arith.subf %0, %5 : vector<16x32xf32>
    %7 = arith.mulf %6, %6 : vector<16x32xf32>
    %cst_2 = arith.constant dense<0.000000e+00> : vector<16xf32>
    %8 = vector.multi_reduction <add>, %7, %cst_2 [1] : vector<16x32xf32> to vector<16xf32>
    %9 = vector.shape_cast %8 : vector<16xf32> to vector<16x1xf32>
    %cst_3 = arith.constant 3.200000e+01 : f32
    %10 = vector.broadcast %cst_3 : f32 to vector<16x1xf32>
    %11 = arith.divf %9, %10 : vector<16x1xf32>
    %cst_4 = arith.constant 9.99999974E-6 : f32
    %12 = vector.broadcast %cst_4 : f32 to vector<16x1xf32>
    %13 = arith.addf %11, %12 : vector<16x1xf32>
    %14 = math.rsqrt %13 : vector<16x1xf32>
    %15 = vector.broadcast %14 : vector<16x1xf32> to vector<16x32xf32>
    %16 = arith.mulf %6, %15 : vector<16x32xf32>
    %c0_5 = arith.constant 0 : index
    %c0_6 = arith.constant 0 : index
    %17 = vector.load %arg5[%c0_5, %c0_6] : memref<1x32xf32, #tpu.memory_space<vmem>>, vector<1x32xf32>
    %18 = vector.broadcast %17 : vector<1x32xf32> to vector<16x32xf32>
    %19 = arith.mulf %16, %18 : vector<16x32xf32>
    %c0_7 = arith.constant 0 : index
    %c0_8 = arith.constant 0 : index
    %20 = vector.load %arg6[%c0_7, %c0_8] : memref<1x32xf32, #tpu.memory_space<vmem>>, vector<1x32xf32>
    %21 = vector.broadcast %20 : vector<1x32xf32> to vector<16x32xf32>
    %22 = arith.addf %19, %21 : vector<16x32xf32>
    %23 = arith.truncf %22 : vector<16x32xf32> to vector<16x32xbf16>
    %c0_9 = arith.constant 0 : index
    %c0_10 = arith.constant 0 : index
    %24 = vector.load %arg3[%c0_9, %c0_10] : memref<32x96xf32, #tpu.memory_space<vmem>>, vector<32x96xf32>
    %25 = arith.truncf %24 : vector<32x96xf32> to vector<32x96xbf16>
    %cst_11 = arith.constant dense<0.000000e+00> : vector<16x96xf32>
    %26 = tpu.matmul %23, %25, %cst_11 {dimension_numbers = #tpu.dot_dimension_numbers<[1], [0], [0], [1], [0, 0, 1, 1], [], []>} : vector<16x32xbf16>, vector<32x96xbf16>, vector<16x96xf32> -> vector<16x96xf32>
    %c0_12 = arith.constant 0 : index
    %c0_13 = arith.constant 0 : index
    %27 = vector.load %arg4[%c0_12, %c0_13] : memref<1x96xf32, #tpu.memory_space<vmem>>, vector<1x96xf32>
    %28 = vector.broadcast %27 : vector<1x96xf32> to vector<16x96xf32>
    %29 = arith.addf %26, %28 : vector<16x96xf32>
    %c0_14 = arith.constant 0 : index
    %c0_15 = arith.constant 0 : index
    %30 = vector.load %arg7[%c0_14, %c0_15] : memref<16x96xf32, #tpu.memory_space<vmem>>, vector<16x96xf32>
    tpu.vector_store %arg7[%c0_14, %c0_15], %29 {strides = array<i32>} : memref<16x96xf32, #tpu.memory_space<vmem>>, vector<16x96xf32>,
    return
  }
  func.func @transform_0(%arg0: i32, %arg1: i32) -> (i32, i32) {
    %c0_i32 = arith.constant 0 : i32
    %c0_i32_0 = arith.constant 0 : i32
    return %arg0, %c0_i32 : i32, i32
  }
  func.func @transform_1(%arg0: i32, %arg1: i32) -> (i32, i32) {
    %c0_i32 = arith.constant 0 : i32
    %c0_i32_0 = arith.constant 0 : i32
    return %c0_i32, %arg1 : i32, i32
  }
  func.func @transform_2(%arg0: i32, %arg1: i32) -> (i32, i32) {
    %c0_i32 = arith.constant 0 : i32
    %c0_i32_0 = arith.constant 0 : i32
    return %c0_i32, %arg1 : i32, i32
  }
  func.func @transform_3(%arg0: i32, %arg1: i32) -> (i32, i32) {
    %c0_i32 = arith.constant 0 : i32
    %c0_i32_0 = arith.constant 0 : i32
    %c0_i32_1 = arith.constant 0 : i32
    return %c0_i32, %c0_i32_0 : i32, i32
  }
  func.func @transform_4(%arg0: i32, %arg1: i32) -> (i32, i32) {
    %c0_i32 = arith.constant 0 : i32
    %c0_i32_0 = arith.constant 0 : i32
    %c0_i32_1 = arith.constant 0 : i32
    return %c0_i32, %c0_i32_0 : i32, i32
  }
  func.func @transform_5(%arg0: i32, %arg1: i32) -> (i32, i32) {
    %c0_i32 = arith.constant 0 : i32
    return %arg0, %arg1 : i32, i32
  }
}

</mosaic_0001>

<bundles_post_ra>
// kernel: tpu_custom_call.1
= control target key start
LH: loop header
LB: loop body
LE: loop exit
PB: predicated region body
PF: predicated region fallthrough
CT: control target
= control target key end

     0   :  { %10 = vsyncpa [#allocation3], 0  ;;  %s371_s0 = inlined_call_operand.hbm [shape: f32[16,32], index: 0, kind: input, shape index: {}]   ;;  %s372_s1 = inlined_call_operand.hbm [shape: f32[32,96], index: 1, kind: input, shape index: {}]   ;;  %s373_s2 = inlined_call_operand.vmem [shape: f32[1,96], index: 2, kind: input, shape index: {}]   ;;  %s374_s3 = inlined_call_operand.vmem [shape: f32[1,32], index: 3, kind: input, shape index: {}]   ;;  %s375_s4 = inlined_call_operand.vmem [shape: f32[1,32], index: 4, kind: input, shape index: {}]   ;;  %s376_s5 = inlined_call_operand.hbm [shape: f32[16,96], index: 5, kind: output, shape index: {}]  }
   0x1   :  { %11 = vsyncpa [#allocation6], 0 }
   0x2   :  { %12 = vsyncpa [#allocation4], 0  ;;  %s275_s18 = smov [#allocation2]   ;;  %s203_s22 = scalar_lea.hbm %s371_s0, 256 }
   0x3   :  { %s18_s19 = sshll.u32 %s275_s18, 4  ;;  %p204_p0 = scmp.ne.s32.totalorder %s371_s0, %s203_s22  ;;  %s19_s19 = int_to_ptr.vmem [resolvable:$true] %s18_s19 }
   0x4   :  { %p207_p1 = scmp.lt.u32.totalorder %s203_s22, %s371_s0 }
   0x6   :  { %p209_p2 = pnand %p207_p1, %p204_p0 }
   0x8   :  { %212 = shalt.err (!%p209_p2)
}
   0x9   :  { %s213_s27 = scalar_lea.vmem %s19_s19, 256  ;;  %p218_p4 = scmp.lt.s32.totalorder %s19_s19, %s19_s19 }
   0xa   :  { %p214_p3 = scmp.ne.s32.totalorder %s19_s19, %s213_s27  ;;  %p219_p5 = scmp.lt.s32.totalorder %s213_s27, %s213_s27 }
   0xc   :  { %p220_p6 = por %p219_p5, %p218_p4 }
   0xe   :  { %p221_p7 = pnand %p220_p6, %p214_p3 }
  0x10   :  { %224 = shalt.err (!%p221_p7)
}
  0x11   :  { %s276_s28 = smov 128   ;;  %s277_s29 = smov 8  }
  0x12   :  { %24 = dma.hbm_to_vmem [thread:$0]  %s371_s0, 256, %s19_s19, [#allocation3], %s276_s28, %s276_s28, %s277_s29  }
  0x13   :  { %s278_s7 = smov [#allocation5]   ;;  %s225_s11 = scalar_lea.hbm %s372_s1, 512 }
  0x14   :  { %s30_s8 = sshll.u32 %s278_s7, 4  ;;  %p226_p8 = scmp.ne.s32.totalorder %s372_s1, %s225_s11  ;;  %s31_s8 = int_to_ptr.vmem [resolvable:$true] %s30_s8 }
  0x15   :  { %p229_p9 = scmp.lt.u32.totalorder %s225_s11, %s372_s1 }
  0x17   :  { %p231_p10 = pnand %p229_p9, %p226_p8 }
  0x19   :  { %234 = shalt.err (!%p231_p10)
}
  0x1a   :  { %s235_s16 = scalar_lea.vmem %s31_s8, 512  ;;  %p240_p12 = scmp.lt.s32.totalorder %s31_s8, %s31_s8 }
  0x1b   :  { %p236_p11 = scmp.ne.s32.totalorder %s31_s8, %s235_s16  ;;  %p241_p13 = scmp.lt.s32.totalorder %s235_s16, %s235_s16 }
  0x1d   :  { %p242_p0 = por %p241_p13, %p240_p12 }
  0x1f   :  { %p243_p1 = pnand %p242_p0, %p236_p11 }
  0x21   :  { %246 = shalt.err (!%p243_p1)
}
  0x22   :  { %36 = dma.hbm_to_vmem [thread:$0]  %s372_s1, 512, %s31_s8, [#allocation6], %s276_s28, %s276_s28, %s277_s29  }
  0x23   :  { %269 = dma.done.wait [#allocation3], 256  }
  0x24   :  { %270 = vsyncadd [#allocation3], 4294967040 }
  0x25   :  { %271 = dma.done.wait [#allocation6], 512  }
  0x26   :  { %272 = vsyncadd [#allocation6], 4294966784  ;;  %vm52_vm0 = vcmask 261120   ;;  %v50_v0 = vld [vmem:[#allocation2] sm:$0xff]  ;;  %v51_v1 = vld [vmem:[#allocation2 + $0x8] sm:$0xff]  ;;  %v279_v17 = vmov 0.0  }
  0x27   :  { %v53_v2 = vsel %vm52_vm0, %v50_v0, 0.0  ;;  %v56_v3 = vsel %vm52_vm0, %v51_v1, 0.0  ;;  %v99_v14 = vld [vmem:[#allocation5] sm:$0xff]  ;;  %v100_v15 = vld [vmem:[#allocation5 + $0x8] sm:$0xff]  ;;  %184 = vmatprep.subr.bf16.mxu0 %v279_v17  ;;  %v101_v18 = vld [vmem:[#allocation5 + $0x10] sm:$0xff]  ;;  %vm280_vm1 = vmmov 0  }
  0x28   :  { %54 = vadd.xlane.f32.xlu0 %v53_v2  ;;  %v103_v16 = vpack.c.bf16 %v100_v15, %v99_v14  ;;  %v102_v19 = vld [vmem:[#allocation5 + $0x18] sm:$0xff]  ;;  %188 = vmatprep.mubr.msk.bf16.mxu0 %vm280_vm1, %v279_v17  ;;  %v177_v29 = vld [vmem:[%s374_s3] ss:$0 sm:$0xff]  ;;  %vm156_vm2 = vcmask 785408   ;;  %s281_s3 = smov [#allocation7]  }
  0x29   :  { %v104_v20 = vpack.c.bf16 %v102_v19, %v101_v18  ;;  %v178_v33 = vld [vmem:[%s375_s4] ss:$0 sm:$0xff]  ;;  %s164_s23 = sshll.u32 %s281_s3, 4  ;;  %s165_s23 = int_to_ptr.vmem [resolvable:$true] %s164_s23 }
  0x2a   :  { %185 = vmatpush3.bf16.msra.mxu0 %v103_v16  ;;  %v179_v38 = vld [vmem:[%s373_s2] ss:$0 sm:$0xff]  ;;  %s247_s4 = scalar_lea.vmem %s165_s23, 256  ;;  %p252_p3 = scmp.lt.s32.totalorder %s165_s23, %s165_s23 }
  0x2b   :  { %186 = vmatprep.subr.bf16.mxu0 %v279_v17  ;;  %p248_p2 = scmp.ne.s32.totalorder %s165_s23, %s247_s4  ;;  %p253_p4 = scmp.lt.s32.totalorder %s247_s4, %s247_s4 }
  0x2c   :  { %57 = vadd.xlane.f32.xlu0 %v56_v3 }
  0x2d   :  { %p254_p5 = por %p253_p4, %p252_p3 }
  0x2e   :  { %187 = vmatpush3.bf16.msra.mxu0 %v104_v20 }
  0x2f   :  { %p255_p6 = pnand %p254_p5, %p248_p2 }
  0xb5   :  { %v55_v4 = vpop.xlane.xlu0 %54 }
  0xb6   :  { %v60_v5 = vmul.f32 0.03125, %v55_v4 }
  0xb8   :  { %v62_v6 = vsub.f32 %v50_v0, %v60_v5 }
  0xb9   :  { %v58_v7 = vpop.xlane.xlu0 %57 }
  0xba   :  { %v61_v8 = vmul.f32 0.03125, %v58_v7  ;;  %v64_v9 = vmul.f32 %v62_v6, %v62_v6 }
  0xbc   :  { %v63_v10 = vsub.f32 %v51_v1, %v61_v8  ;;  %v66_v11 = vsel %vm52_vm0, %v64_v9, 0.0 }
  0xbd   :  { %67 = vadd.xlane.f32.xlu1 %v66_v11 }
  0xbe   :  { %v65_v12 = vmul.f32 %v63_v10, %v63_v10 }
  0xc0   :  { %v69_v13 = vsel %vm52_vm0, %v65_v12, 0.0 }
  0xc1   :  { %70 = vadd.xlane.f32.xlu1 %v69_v13 }
 0x14a   :  { %v68_v21 = vpop.xlane.xlu1 %67 }
 0x14b   :  { %v72_v22 = vmul.f32 0.03125, %v68_v21 }
 0x14d   :  { %v74_v23 = vadd.f32 1e-05, %v72_v22 }
 0x14e   :  { %v71_v24 = vpop.xlane.xlu1 %70 }
 0x14f   :  { %199 = vrsqrt.f32 %v74_v23  ;;  %v73_v25 = vmul.f32 0.03125, %v71_v24 }
 0x151   :  { %v75_v26 = vadd.f32 1e-05, %v73_v25 }
 0x153   :  { %201 = vrsqrt.f32 %v75_v26 }
 0x159   :  { %v200_v27 = vpop.eup %199 }
 0x15a   :  { %v78_v28 = vmul.f32 %v200_v27, %v62_v6 }
 0x15c   :  { %v87_v32 = vmul.f32 %v177_v29, %v78_v28 }
 0x15d   :  { %v202_v30 = vpop.eup %201 }
 0x15e   :  { %v79_v31 = vmul.f32 %v202_v30, %v63_v10  ;;  %v96_v35 = vadd.f32 %v178_v33, %v87_v32 }
 0x160   :  { %v88_v34 = vmul.f32 %v177_v29, %v79_v31 }
 0x162   :  { %v97_v36 = vadd.f32 %v178_v33, %v88_v34 }
 0x164   :  { %v98_v37 = vpack.c.bf16 %v97_v36, %v96_v35 }
 0x166   :  { %189 = vmatmul.mubr.msk.bf16.vlgmr.msra.gmra.mrb[0].mxu0 %vm52_vm0, %v98_v37 }
 0x239   :  { %v149_v39 = vpop.f32.mrb[0].mxu0 }
 0x23a   :  { %v150_v40 = vadd.f32 %v179_v38, %v149_v39  ;;  %v190_v41 = vpop.f32.mrb[1].mxu0 }
 0x23b   :  { %v152_v42 = vpop.f32.mrb[2].mxu0 }
 0x23c   :  { %v153_v43 = vadd.f32 %v179_v38, %v152_v42  ;;  %v191_v44 = vpop.f32.mrb[3].mxu0  ;;  %157 = vst.msk [vmem:[#allocation7] sm:$0xff] %vm156_vm2, %v150_v40 }
 0x23e   :  { %158 = vst.msk [vmem:[#allocation7 + $0x8] sm:$0xff] %vm156_vm2, %v153_v43 }
 0x23f   :  { %258 = shalt.err (!%p255_p6)
}
 0x240   :  { %s259_s25 = scalar_lea.hbm %s376_s5, 256 }
 0x241   :  { %p260_p7 = scmp.ne.s32.totalorder %s376_s5, %s259_s25  ;;  %p263_p8 = scmp.lt.u32.totalorder %s259_s25, %s376_s5 }
 0x243   :  { %p265_p9 = pnand %p263_p8, %p260_p7 }
 0x245   :  { %268 = shalt.err (!%p265_p9)
}
 0x246   :  { %170 = dma.vmem_to_hbm [thread:$0]  %s165_s23, 256, %s376_s5, [#allocation4], %s276_s28, %s276_s28, %s277_s29  }
 0x247   :  { %273 = dma.done.wait [#allocation4], 256  }
 0x248   :  { %274 = vsyncadd [#allocation4], 4294967040 }
 0x249   :  { %174 = vsyncpa [#allocation3], 1 }
 0x24a   :  { %175 = vsyncpa [#allocation6], 1 }
 0x24b   :  { %176 = vsyncpa [#allocation4], 1 }

</bundles_post_ra>
